<compile_context>
chip_gen: v5e
topology: v5e:2x2
jax: 0.10.0
libtpu: 0.0.40
codegen_flags: <defaults>
</compile_context>

<pallas_src>
import jax
import jax.numpy as jnp
from jax.experimental import pallas as pl
from jax.experimental.pallas import tpu as pltpu

LEAKY_SLOPE = 0.01   # nn.LeakyReLU() default
OUT_PAD = 128        # lane width of the in-kernel layer-2 result tile


# ---------------------------------------------------------------------------
# Kernel: h = leaky_relu(x @ W1cat + b1cat);  out = (h @ W2bd + b2)[:, :1+num_outputs]
# ---------------------------------------------------------------------------
def actor_critic_kernel(x_ref, w1_ref, b1_ref, w2_ref, b2_ref, out_ref):
    x = x_ref[...]                                            # (TB, num_inputs) f32
    h = jnp.dot(x, w1_ref[...], preferred_element_type=jnp.float32) + b1_ref[...]
    h = jnp.where(h > 0, h, LEAKY_SLOPE * h)                  # LeakyReLU on (TB, 2H)
    full = (
        jnp.dot(h, w2_ref[...], preferred_element_type=jnp.float32) + b2_ref[...]
    )                                                         # (TB, 128) lane-dense in VMEM
    # Store only the useful columns [value | mu]; avoids ~64x excess HBM writeback.
    out_ref[...] = full[:, : out_ref.shape[1]]


# ---------------------------------------------------------------------------
# Parameter packing (done once, outside the hot path)
# ---------------------------------------------------------------------------
def pack_params(p):
    """Fuse critic/actor params into the kernel's layout."""
    num_inputs, hidden = p["wc1"].shape
    num_outputs = p["wa2"].shape[1]
    assert 1 + num_outputs <= OUT_PAD

    w1 = jnp.concatenate([p["wc1"], p["wa1"]], axis=1)        # (num_inputs, 2H)
    b1 = jnp.concatenate([p["bc1"], p["ba1"]], axis=1)        # (1, 2H)

    w2 = jnp.zeros((2 * hidden, OUT_PAD), jnp.float32)        # block-diag + lane pad
    w2 = w2.at[:hidden, 0:1].set(p["wc2"])                    # value column
    w2 = w2.at[hidden:, 1:1 + num_outputs].set(p["wa2"])      # mu columns
    b2 = jnp.zeros((1, OUT_PAD), jnp.float32)
    b2 = b2.at[:, 0:1].set(p["bc2"])
    b2 = b2.at[:, 1:1 + num_outputs].set(p["ba2"])

    return {"w1": w1, "b1": b1, "w2": w2, "b2": b2, "log_std": p["log_std"]}


# ---------------------------------------------------------------------------
# Batch-tile selection
# ---------------------------------------------------------------------------
def _pick_batch_tile(B):
    if B <= 512:
        return B                      # single block; block dim == full array dim is legal
    # >= 2 grid steps so v7x's dual TensorCores both get work; cap the tile at 1024
    # (x 2x0.5 MiB + out 2x~8 KiB + h 2 MiB + weights ~0.5 MiB << 32 MiB scoped VMEM).
    half = -(-B // 2)                 # ceil(B / 2)
    return min(1024, ((half + 7) // 8) * 8)


# ---------------------------------------------------------------------------
# Forward wrapper
# ---------------------------------------------------------------------------
def actor_critic_forward(x, packed):
    """x: (B, num_inputs) f32, packed from pack_params. Returns (mu, std, value)."""
    B, num_inputs = x.shape
    two_h = packed["w1"].shape[1]
    num_outputs = packed["log_std"].shape[1]
    n_out = 1 + num_outputs

    tb = _pick_batch_tile(B)
    grid = (pl.cdiv(B, tb),)

    flops = 2 * B * (num_inputs * two_h + two_h * OUT_PAD)
    bytes_accessed = 4 * (
        B * num_inputs + num_inputs * two_h + two_h
        + two_h * OUT_PAD + OUT_PAD + B * n_out
    )

    out = pl.pallas_call(
        actor_critic_kernel,
        out_shape=jax.ShapeDtypeStruct((B, n_out), jnp.float32),
        grid=grid,
        in_specs=[
            pl.BlockSpec((tb, num_inputs), lambda i: (i, 0)),      # x: streamed by batch
            # Constant index_maps -> blocks stay VMEM-resident across grid steps.
            pl.BlockSpec((num_inputs, two_h), lambda i: (0, 0)),   # W1cat
            pl.BlockSpec((1, two_h), lambda i: (0, 0)),            # b1cat
            pl.BlockSpec((two_h, OUT_PAD), lambda i: (0, 0)),      # W2 block-diag (lane pad)
            pl.BlockSpec((1, OUT_PAD), lambda i: (0, 0)),          # b2 (lane pad)
        ],
        out_specs=pl.BlockSpec((tb, n_out), lambda i: (i, 0)),     # narrow [value|mu] output
        compiler_params=pltpu.CompilerParams(
            dimension_semantics=("parallel",),
        ),
        cost_estimate=pl.CostEstimate(
            flops=flops, transcendentals=0, bytes_accessed=bytes_accessed
        ),
    )(x, packed["w1"], packed["b1"], packed["w2"], packed["b2"])

    value = out[:, 0:1]                                        # (B, 1)
    mu = out[:, 1:1 + num_outputs]                             # (B, num_outputs)
    # std is batch-independent -> computed outside the kernel.
    std = jnp.broadcast_to(jnp.exp(packed["log_std"]), mu.shape)
    return mu, std, value


# ---------------------------------------------------------------------------
# Init mirroring init_weights: orthogonal weights, bias = 0.1
# Weights stored as (in_features, out_features) so the kernel computes x @ W.
# ---------------------------------------------------------------------------
def init_params(key, num_inputs, num_outputs, hidden_size, std=0.0):
    k1, k2, k3, k4 = jax.random.split(key, 4)
    ortho = jax.nn.initializers.orthogonal()
    return {
        "wc1": ortho(k1, (num_inputs, hidden_size), jnp.float32),
        "bc1": jnp.full((1, hidden_size), 0.1, jnp.float32),
        "wc2": ortho(k2, (hidden_size, 1), jnp.float32),
        "bc2": jnp.full((1, 1), 0.1, jnp.float32),
        "wa1": ortho(k3, (num_inputs, hidden_size), jnp.float32),
        "ba1": jnp.full((1, hidden_size), 0.1, jnp.float32),
        "wa2": ortho(k4, (hidden_size, num_outputs), jnp.float32),
        "ba2": jnp.full((1, num_outputs), 0.1, jnp.float32),
        "log_std": jnp.full((1, num_outputs), std, jnp.float32),
    }


def reference_forward(x, p):
    hc_pre = x @ p["wc1"] + p["bc1"]
    hc = jnp.where(hc_pre > 0, hc_pre, LEAKY_SLOPE * hc_pre)
    value = hc @ p["wc2"] + p["bc2"]
    ha_pre = x @ p["wa1"] + p["ba1"]
    ha = jnp.where(ha_pre > 0, ha_pre, LEAKY_SLOPE * ha_pre)
    mu = ha @ p["wa2"] + p["ba2"]
    std = jnp.broadcast_to(jnp.exp(p["log_std"]), mu.shape)
    return mu, std, value


def _check(x, params, packed):
    mu, std, value = jax.block_until_ready(actor_critic_forward(x, packed))
    mu_r, std_r, value_r = reference_forward(x, params)
    B = x.shape[0]
    num_outputs = params["log_std"].shape[1]
    assert mu.shape == (B, num_outputs)
    assert std.shape == (B, num_outputs)
    assert value.shape == (B, 1)
    assert jnp.allclose(mu, mu_r, atol=1e-5, rtol=1e-5)
    assert jnp.allclose(std, std_r, atol=1e-5, rtol=1e-5)
    assert jnp.allclose(value, value_r, atol=1e-5, rtol=1e-5)


if __name__ == "__main__":
    # Pendulum-v1: observation dim 3, action dim 1; hidden_size from the script.
    num_inputs = 3
    num_outputs = 1
    hidden_size = 256

    key = jax.random.PRNGKey(0)
    kx, kx_big, kp = jax.random.split(key, 3)
    params = init_params(kp, num_inputs, num_outputs, hidden_size, std=0.0)
    packed = jax.tree_util.tree_map(jnp.asarray, pack_params(params))

    # Tiny env-step batch (single-block path).
    x_small = jax.random.normal(kx, (8, num_inputs), dtype=jnp.float32)
    _check(x_small, params, packed)

    # Rollout-sized batch, not divisible by the tile -> multi-step grid + ragged last block.
    x_big = jax.random.normal(kx_big, (1000, num_inputs), dtype=jnp.float32)
    _check(x_big, params, packed)

    print("KERNEL_OK")
</pallas_src>

<mosaic_0001>
module attributes {stable_mosaic.version = 11 : i64} {
  func.func @actor_critic_kernel(%arg0: i32, %arg1: memref<8x3xf32, #tpu.memory_space<vmem>>, %arg2: memref<3x512xf32, #tpu.memory_space<vmem>>, %arg3: memref<1x512xf32, #tpu.memory_space<vmem>>, %arg4: memref<512x128xf32, #tpu.memory_space<vmem>>, %arg5: memref<1x128xf32, #tpu.memory_space<vmem>>, %arg6: memref<8x2xf32, #tpu.memory_space<vmem>>) attributes {dimension_semantics = [#tpu.dimension_semantics<parallel>], iteration_bounds = array<i64: 1>, scalar_prefetch = 0 : i64, scratch_operands = 0 : i64, tpu.core_type = #tpu.core_type<tc>, window_params = [{transform_indices = @transform_0, window_bounds = array<i64: 8, 3>}, {pipeline_mode = #tpu.pipeline_mode<synchronous>, transform_indices = @transform_1, window_bounds = array<i64: 3, 512>}, {pipeline_mode = #tpu.pipeline_mode<synchronous>, transform_indices = @transform_2, window_bounds = array<i64: 1, 512>}, {pipeline_mode = #tpu.pipeline_mode<synchronous>, transform_indices = @transform_3, window_bounds = array<i64: 512, 128>}, {pipeline_mode = #tpu.pipeline_mode<synchronous>, transform_indices = @transform_4, window_bounds = array<i64: 1, 128>}, {transform_indices = @transform_5, window_bounds = array<i64: 8, 2>}]} {
    %c0 = arith.constant 0 : index
    %c0_0 = arith.constant 0 : index
    %0 = vector.load %arg1[%c0, %c0_0] : memref<8x3xf32, #tpu.memory_space<vmem>>, vector<8x3xf32>
    %c0_1 = arith.constant 0 : index
    %c0_2 = arith.constant 0 : index
    %1 = vector.load %arg2[%c0_1, %c0_2] : memref<3x512xf32, #tpu.memory_space<vmem>>, vector<3x512xf32>
    %cst = arith.constant dense<0.000000e+00> : vector<8x512xf32>
    %2 = tpu.matmul %0, %1, %cst {dimension_numbers = #tpu.dot_dimension_numbers<[1], [0], [0], [1], [0, 0, 1, 1], [], []>} : vector<8x3xf32>, vector<3x512xf32>, vector<8x512xf32> -> vector<8x512xf32>
    %c0_3 = arith.constant 0 : index
    %c0_4 = arith.constant 0 : index
    %3 = vector.load %arg3[%c0_3, %c0_4] : memref<1x512xf32, #tpu.memory_space<vmem>>, vector<1x512xf32>
    %4 = vector.broadcast %3 : vector<1x512xf32> to vector<8x512xf32>
    %5 = arith.addf %2, %4 : vector<8x512xf32>
    %cst_5 = arith.constant 0.000000e+00 : f32
    %6 = vector.broadcast %cst_5 : f32 to vector<8x512xf32>
    %7 = arith.cmpf ogt, %5, %6 : vector<8x512xf32>
    %cst_6 = arith.constant 0.00999999977 : f32
    %8 = vector.broadcast %cst_6 : f32 to vector<8x512xf32>
    %9 = arith.mulf %8, %5 : vector<8x512xf32>
    %10 = arith.select %7, %5, %9 : vector<8x512xi1>, vector<8x512xf32>
    %c0_7 = arith.constant 0 : index
    %c0_8 = arith.constant 0 : index
    %11 = vector.load %arg4[%c0_7, %c0_8] : memref<512x128xf32, #tpu.memory_space<vmem>>, vector<512x128xf32>
    %cst_9 = arith.constant dense<0.000000e+00> : vector<8x128xf32>
    %12 = tpu.matmul %10, %11, %cst_9 {dimension_numbers = #tpu.dot_dimension_numbers<[1], [0], [0], [1], [0, 0, 1, 1], [], []>} : vector<8x512xf32>, vector<512x128xf32>, vector<8x128xf32> -> vector<8x128xf32>
    %c0_10 = arith.constant 0 : index
    %c0_11 = arith.constant 0 : index
    %13 = vector.load %arg5[%c0_10, %c0_11] : memref<1x128xf32, #tpu.memory_space<vmem>>, vector<1x128xf32>
    %14 = vector.broadcast %13 : vector<1x128xf32> to vector<8x128xf32>
    %15 = arith.addf %12, %14 : vector<8x128xf32>
    %16 = vector.extract_strided_slice %15 {offsets = [0, 0], sizes = [8, 2], strides = [1, 1]} : vector<8x128xf32> to vector<8x2xf32>
    %c0_12 = arith.constant 0 : index
    %c0_13 = arith.constant 0 : index
    %17 = vector.load %arg6[%c0_12, %c0_13] : memref<8x2xf32, #tpu.memory_space<vmem>>, vector<8x2xf32>
    tpu.vector_store %arg6[%c0_12, %c0_13], %16 {strides = array<i32>} : memref<8x2xf32, #tpu.memory_space<vmem>>, vector<8x2xf32>,
    return
  }
  func.func @transform_0(%arg0: i32) -> (i32, i32) {
    %c0_i32 = arith.constant 0 : i32
    %c0_i32_0 = arith.constant 0 : i32
    return %arg0, %c0_i32 : i32, i32
  }
  func.func @transform_1(%arg0: i32) -> (i32, i32) {
    %c0_i32 = arith.constant 0 : i32
    %c0_i32_0 = arith.constant 0 : i32
    %c0_i32_1 = arith.constant 0 : i32
    return %c0_i32, %c0_i32_0 : i32, i32
  }
  func.func @transform_2(%arg0: i32) -> (i32, i32) {
    %c0_i32 = arith.constant 0 : i32
    %c0_i32_0 = arith.constant 0 : i32
    %c0_i32_1 = arith.constant 0 : i32
    return %c0_i32, %c0_i32_0 : i32, i32
  }
  func.func @transform_3(%arg0: i32) -> (i32, i32) {
    %c0_i32 = arith.constant 0 : i32
    %c0_i32_0 = arith.constant 0 : i32
    %c0_i32_1 = arith.constant 0 : i32
    return %c0_i32, %c0_i32_0 : i32, i32
  }
  func.func @transform_4(%arg0: i32) -> (i32, i32) {
    %c0_i32 = arith.constant 0 : i32
    %c0_i32_0 = arith.constant 0 : i32
    %c0_i32_1 = arith.constant 0 : i32
    return %c0_i32, %c0_i32_0 : i32, i32
  }
  func.func @transform_5(%arg0: i32) -> (i32, i32) {
    %c0_i32 = arith.constant 0 : i32
    %c0_i32_0 = arith.constant 0 : i32
    return %arg0, %c0_i32 : i32, i32
  }
}

</mosaic_0001>

<bundles_post_ra>
// kernel: tpu_custom_call.1
= control target key start
LH: loop header
LB: loop body
LE: loop exit
PB: predicated region body
PF: predicated region fallthrough
CT: control target
= control target key end

     0   :  { %10 = vsyncpa [#allocation3], 0  ;;  %s454_s0 = inlined_call_operand.vmem [shape: f32[8,3], index: 0, kind: input, shape index: {}]   ;;  %s455_s1 = inlined_call_operand.hbm [shape: f32[3,512], index: 1, kind: input, shape index: {}]   ;;  %s456_s2 = inlined_call_operand.vmem [shape: f32[1,512], index: 2, kind: input, shape index: {}]   ;;  %s457_s3 = inlined_call_operand.hbm [shape: f32[512,128], index: 3, kind: input, shape index: {}]   ;;  %s458_s4 = inlined_call_operand.vmem [shape: f32[1,128], index: 4, kind: input, shape index: {}]   ;;  %s459_s5 = inlined_call_operand.vmem [shape: f32[8,2], index: 5, kind: output, shape index: {}]  }
   0x1   :  { %s19_s20 = sshll.u32 %s455_s1, 4  ;;  %s20_s20 = int_to_ptr.hbm [resolvable:$true] %s19_s20 }
   0x2   :  { %11 = vsyncpa [#allocation5], 0  ;;  %s398_s21 = smov [#allocation2]   ;;  %s31_s25 = sshll.u32 %s457_s3, 4  ;;  %s32_s25 = int_to_ptr.hbm [resolvable:$true] %s31_s25 }
   0x3   :  { %s21_s22 = sshll.u32 %s398_s21, 4  ;;  %s399_s26 = smov [#allocation4]   ;;  %s22_s22 = int_to_ptr.vmem [resolvable:$true] %s21_s22 }
   0x4   :  { %24 = dma.hbm_to_vmem [thread:$0]  %s20_s20, 256, %s22_s22, [#allocation3]  }
   0x5   :  { %s33_s27 = sshll.u32 %s399_s26, 4  ;;  %s400_s28 = smov 128   ;;  %s34_s27 = int_to_ptr.vmem [resolvable:$true] %s33_s27 }
   0x6   :  { %s401_s29 = smov 8  }
   0x7   :  { %39 = dma.hbm_to_vmem [thread:$0]  %s32_s25, 8192, %s34_s27, [#allocation5], %s400_s28, %s400_s28, %s401_s29  }
   0x8   :  { %394 = dma.done.wait [#allocation3], 256  }
   0x9   :  { %395 = vsyncadd [#allocation3], 4294967040 }
   0xa   :  { %396 = dma.done.wait [#allocation5], 8192  }
   0xb   :  { %397 = vsyncadd [#allocation5], 4294959104  ;;  %v52_v0 = vld [vmem:[#allocation2 + $0x8] sm:$0x77]  ;;  %v51_v1 = vld [vmem:[#allocation2] sm:$0x77] }
   0xc   :  { %67 = vst [vmem:[#allocation1 + $0x10] ss:$2 sm:$0xff] %v52_v0  ;;  %vm76_vm0 = vcmask 1042432   ;;  %v50_v2 = vld [vmem:[%s454_s0] sm:$0xff]  ;;  %vm72_vm1 = vcmask 23552   ;;  %v192_v7 = vld [vmem:[#allocation4 + $0x78] sm:$0xff] }
   0xd   :  { %65 = vst [vmem:[#allocation1] ss:$2 sm:$0xff] %v51_v1  ;;  %v224_v8 = vld [vmem:[#allocation4 + $0x178] sm:$0xff]  ;;  %v191_v11 = vld [vmem:[#allocation4 + $0x70] sm:$0xff]  ;;  %v190_v15 = vld [vmem:[#allocation4 + $0x68] sm:$0xff]  ;;  %vm325_vm6 = vcmask 15360  }
   0xe   :  { %v240_v9 = vld [vmem:[#allocation4 + $0x1f8] sm:$0xff]  ;;  %v223_v12 = vld [vmem:[#allocation4 + $0x170] sm:$0xff]  ;;  %v222_v16 = vld [vmem:[#allocation4 + $0x168] sm:$0xff] }
   0xf   :  { %v208_v10 = vld [vmem:[#allocation4 + $0xf8] sm:$0xff]  ;;  %v239_v13 = vld [vmem:[#allocation4 + $0x1f0] sm:$0xff]  ;;  %v238_v17 = vld [vmem:[#allocation4 + $0x1e8] sm:$0xff] }
  0x10   :  { %v207_v14 = vld [vmem:[#allocation4 + $0xf0] sm:$0xff]  ;;  %v206_v18 = vld [vmem:[#allocation4 + $0xe8] sm:$0xff]  ;;  %v189_v19 = vld [vmem:[#allocation4 + $0x60] sm:$0xff] }
  0x11   :  { %v221_v20 = vld [vmem:[#allocation4 + $0x160] sm:$0xff]  ;;  %v188_v23 = vld [vmem:[#allocation4 + $0x58] sm:$0xff]  ;;  %v187_v27 = vld [vmem:[#allocation4 + $0x50] sm:$0xff] }
  0x12   :  { %v237_v21 = vld [vmem:[#allocation4 + $0x1e0] sm:$0xff]  ;;  %v220_v24 = vld [vmem:[#allocation4 + $0x158] sm:$0xff]  ;;  %v219_v28 = vld [vmem:[#allocation4 + $0x150] sm:$0xff] }
  0x13   :  { %v70_v3 = vld.sshfl [vmem:[#allocation1 + $0x10] sm:$0xff pattern:$0x75316420]  ;;  %v71_v4 = vld.sshfl [vmem:[#allocation1 + $0x18] sm:$0xff pattern:$0x75316420] }
  0x14   :  { %337 = vmatpush.msk.msra.mxu2 %vm76_vm0, %v70_v3  ;;  %339 = vmatpush.msk.msra.mxu3 %vm76_vm0, %v71_v4  ;;  %v68_v5 = vld.sshfl [vmem:[#allocation1] sm:$0xff pattern:$0x75316420]  ;;  %v69_v6 = vld.sshfl [vmem:[#allocation1 + $0x8] sm:$0xff pattern:$0x75316420] }
  0x15   :  { %338 = vmatmul.msk.f32.vlgmr.msra.gmra.mxu2 %vm72_vm1, %v50_v2  ;;  %340 = vmatmul.msk.f32.vlgmr.msra.gmra.mxu3 %vm72_vm1, %v50_v2  ;;  %v205_v22 = vld [vmem:[#allocation4 + $0xe0] sm:$0xff]  ;;  %v236_v25 = vld [vmem:[#allocation4 + $0x1d8] sm:$0xff]  ;;  %v235_v29 = vld [vmem:[#allocation4 + $0x1d0] sm:$0xff] }
  0x16   :  { %333 = vmatpush.msk.msra.mxu0 %vm76_vm0, %v68_v5  ;;  %335 = vmatpush.msk.msra.mxu1 %vm76_vm0, %v69_v6  ;;  %v204_v26 = vld [vmem:[#allocation4 + $0xd8] sm:$0xff]  ;;  %v203_v30 = vld [vmem:[#allocation4 + $0xd0] sm:$0xff]  ;;  %v186_v31 = vld [vmem:[#allocation4 + $0x48] sm:$0xff] }
  0x17   :  { %334 = vmatmul.msk.f32.vlgmr.msra.gmra.mxu0 %vm72_vm1, %v50_v2  ;;  %336 = vmatmul.msk.f32.vlgmr.msra.gmra.mxu1 %vm72_vm1, %v50_v2  ;;  %v218_v32 = vld [vmem:[#allocation4 + $0x148] sm:$0xff]  ;;  %v185_v35 = vld [vmem:[#allocation4 + $0x40] sm:$0xff]  ;;  %v184_v39 = vld [vmem:[#allocation4 + $0x38] sm:$0xff] }
  0x18   :  { %245 = vmatpush.msrb.mxu0 %v192_v7  ;;  %285 = vmatpush.msrb.mxu2 %v224_v8  ;;  %v234_v33 = vld [vmem:[#allocation4 + $0x1c8] sm:$0xff]  ;;  %v217_v36 = vld [vmem:[#allocation4 + $0x140] sm:$0xff]  ;;  %v216_v40 = vld [vmem:[#allocation4 + $0x138] sm:$0xff] }
  0x19   :  { %305 = vmatpush.msrb.mxu3 %v240_v9  ;;  %265 = vmatpush.msrb.mxu1 %v208_v10  ;;  %v202_v34 = vld [vmem:[#allocation4 + $0xc8] sm:$0xff]  ;;  %v233_v37 = vld [vmem:[#allocation4 + $0x1c0] sm:$0xff]  ;;  %v232_v41 = vld [vmem:[#allocation4 + $0x1b8] sm:$0xff] }
  0x1a   :  { %246 = vmatpush.msrb.mxu0 %v191_v11  ;;  %286 = vmatpush.msrb.mxu2 %v223_v12  ;;  %v201_v38 = vld [vmem:[#allocation4 + $0xc0] sm:$0xff]  ;;  %v200_v42 = vld [vmem:[#allocation4 + $0xb8] sm:$0xff]  ;;  %v183_v43 = vld [vmem:[#allocation4 + $0x30] sm:$0xff] }
  0x1b   :  { %306 = vmatpush.msrb.mxu3 %v239_v13  ;;  %266 = vmatpush.msrb.mxu1 %v207_v14  ;;  %v215_v44 = vld [vmem:[#allocation4 + $0x130] sm:$0xff]  ;;  %v182_v47 = vld [vmem:[#allocation4 + $0x28] sm:$0xff]  ;;  %v181_v51 = vld [vmem:[#allocation4 + $0x20] sm:$0xff] }
  0x1c   :  { %247 = vmatpush.msrb.mxu0 %v190_v15  ;;  %287 = vmatpush.msrb.mxu2 %v222_v16  ;;  %v231_v45 = vld [vmem:[#allocation4 + $0x1b0] sm:$0xff]  ;;  %v214_v48 = vld [vmem:[#allocation4 + $0x128] sm:$0xff]  ;;  %v213_v52 = vld [vmem:[#allocation4 + $0x120] sm:$0xff] }
  0x1d   :  { %307 = vmatpush.msrb.mxu3 %v238_v17  ;;  %267 = vmatpush.msrb.mxu1 %v206_v18  ;;  %v199_v46 = vld [vmem:[#allocation4 + $0xb0] sm:$0xff]  ;;  %v230_v49 = vld [vmem:[#allocation4 + $0x1a8] sm:$0xff]  ;;  %v229_v53 = vld [vmem:[#allocation4 + $0x1a0] sm:$0xff] }
  0x1e   :  { %248 = vmatpush.msrb.mxu0 %v189_v19  ;;  %288 = vmatpush.msrb.mxu2 %v221_v20  ;;  %v198_v50 = vld [vmem:[#allocation4 + $0xa8] sm:$0xff]  ;;  %v197_v54 = vld [vmem:[#allocation4 + $0xa0] sm:$0xff]  ;;  %v180_v55 = vld [vmem:[#allocation4 + $0x18] sm:$0xff] }
  0x1f   :  { %308 = vmatpush.msrb.mxu3 %v237_v21  ;;  %268 = vmatpush.msrb.mxu1 %v205_v22  ;;  %v212_v56 = vld [vmem:[#allocation4 + $0x118] sm:$0xff]  ;;  %v179_v58 = vld [vmem:[#allocation4 + $0x10] sm:$0xff]  ;;  %v178_v62 = vld [vmem:[#allocation4 + $0x8] sm:$0xff] }
  0x20   :  { %249 = vmatpush.msrb.mxu0 %v188_v23  ;;  %289 = vmatpush.msrb.mxu2 %v220_v24  ;;  %v228_v57 = vld [vmem:[#allocation4 + $0x198] sm:$0xff]  ;;  %v211_v60 = vld [vmem:[#allocation4 + $0x110] sm:$0xff]  ;;  %v210_v0 = vld [vmem:[#allocation4 + $0x108] sm:$0xff] }
  0x21   :  { %309 = vmatpush.msrb.mxu3 %v236_v25  ;;  %269 = vmatpush.msrb.mxu1 %v204_v26  ;;  %v196_v59 = vld [vmem:[#allocation4 + $0x98] sm:$0xff]  ;;  %v227_v61 = vld [vmem:[#allocation4 + $0x190] sm:$0xff]  ;;  %v226_v1 = vld [vmem:[#allocation4 + $0x188] sm:$0xff] }
  0x22   :  { %250 = vmatpush.msrb.mxu0 %v187_v27  ;;  %290 = vmatpush.msrb.mxu2 %v219_v28  ;;  %v195_v63 = vld [vmem:[#allocation4 + $0x90] sm:$0xff]  ;;  %v177_v2 = vld [vmem:[#allocation4] sm:$0xff]  ;;  %v194_v3 = vld [vmem:[#allocation4 + $0x88] sm:$0xff] }
  0x23   :  { %310 = vmatpush.msrb.mxu3 %v235_v29  ;;  %270 = vmatpush.msrb.mxu1 %v203_v30  ;;  %v209_v4 = vld [vmem:[#allocation4 + $0x100] sm:$0xff]  ;;  %v53_v7 = vld [vmem:[%s456_s2] sm:$0xf] }
  0x24   :  { %251 = vmatpush.msrb.mxu0 %v186_v31  ;;  %291 = vmatpush.msrb.mxu2 %v218_v32  ;;  %v225_v5 = vld [vmem:[#allocation4 + $0x180] sm:$0xff]  ;;  %v55_v8 = vperm.slane %v53_v7, 0  ;;  %v56_v9 = vperm.slane %v53_v7, 1  ;;  %v57_v13 = vperm.slane %v53_v7, 2  ;;  %v58_v14 = vperm.slane %v53_v7, 3 }
  0x25   :  { %311 = vmatpush.msrb.mxu3 %v234_v33  ;;  %271 = vmatpush.msrb.mxu1 %v202_v34  ;;  %v193_v6 = vld [vmem:[#allocation4 + $0x80] sm:$0xff]  ;;  %v345_v28 = vld [vmem:[%s458_s4] ss:$0 sm:$0xff] }
  0x26   :  { %252 = vmatpush.msrb.mxu0 %v185_v35  ;;  %292 = vmatpush.msrb.mxu2 %v217_v36 }
  0x27   :  { %312 = vmatpush.msrb.mxu3 %v233_v37  ;;  %272 = vmatpush.msrb.mxu1 %v201_v38 }
  0x28   :  { %253 = vmatpush.msrb.mxu0 %v184_v39  ;;  %293 = vmatpush.msrb.mxu2 %v216_v40 }
  0x29   :  { %313 = vmatpush.msrb.mxu3 %v232_v41  ;;  %273 = vmatpush.msrb.mxu1 %v200_v42 }
  0x2a   :  { %254 = vmatpush.msrb.mxu0 %v183_v43  ;;  %294 = vmatpush.msrb.mxu2 %v215_v44 }
  0x2b   :  { %314 = vmatpush.msrb.mxu3 %v231_v45  ;;  %274 = vmatpush.msrb.mxu1 %v199_v46 }
  0x2c   :  { %255 = vmatpush.msrb.mxu0 %v182_v47  ;;  %295 = vmatpush.msrb.mxu2 %v214_v48 }
  0x2d   :  { %315 = vmatpush.msrb.mxu3 %v230_v49  ;;  %275 = vmatpush.msrb.mxu1 %v198_v50 }
  0x2e   :  { %256 = vmatpush.msrb.mxu0 %v181_v51  ;;  %296 = vmatpush.msrb.mxu2 %v213_v52 }
  0x2f   :  { %316 = vmatpush.msrb.mxu3 %v229_v53  ;;  %276 = vmatpush.msrb.mxu1 %v197_v54 }
  0x30   :  { %257 = vmatpush.msrb.mxu0 %v180_v55  ;;  %297 = vmatpush.msrb.mxu2 %v212_v56 }
  0x31   :  { %317 = vmatpush.msrb.mxu3 %v228_v57  ;;  %277 = vmatpush.msrb.mxu1 %v196_v59 }
  0x32   :  { %258 = vmatpush.msrb.mxu0 %v179_v58  ;;  %298 = vmatpush.msrb.mxu2 %v211_v60 }
  0x33   :  { %318 = vmatpush.msrb.mxu3 %v227_v61  ;;  %278 = vmatpush.msrb.mxu1 %v195_v63 }
  0x34   :  { %259 = vmatpush.msrb.mxu0 %v178_v62  ;;  %299 = vmatpush.msrb.mxu2 %v210_v0 }
  0x35   :  { %319 = vmatpush.msrb.mxu3 %v226_v1  ;;  %279 = vmatpush.msrb.mxu1 %v194_v3 }
  0x36   :  { %260 = vmatpush.msrb.mxu0 %v177_v2  ;;  %300 = vmatpush.msrb.mxu2 %v209_v4 }
  0x37   :  { %320 = vmatpush.msrb.mxu3 %v225_v5  ;;  %280 = vmatpush.msrb.mxu1 %v193_v6 }
  0x94   :  { %v102_v10 = vpop.f32.mrf.mxu0  ;;  %v122_v11 = vpop.f32.mrf.mxu1 }
  0x95   :  { %v103_v12 = vadd.f32 %v102_v10, %v55_v8  ;;  %v123_v15 = vadd.f32 %v122_v11, %v56_v9 }
  0x97   :  { %v169_v16 = vmul.f32 0.01, %v103_v12  ;;  %v170_v17 = vmul.f32 0.01, %v123_v15  ;;  %vm165_vm2 = vcmp.gt.f32.partialorder %v103_v12, 0.0  ;;  %vm166_vm3 = vcmp.gt.f32.partialorder %v123_v15, 0.0 }
  0x98   :  { %v142_v18 = vpop.f32.mrf.mxu2  ;;  %v162_v19 = vpop.f32.mrf.mxu3 }
  0x99   :  { %v143_v20 = vadd.f32 %v142_v18, %v57_v13  ;;  %v163_v21 = vadd.f32 %v162_v19, %v58_v14  ;;  %v173_v22 = vsel %vm165_vm2, %v103_v12, %v169_v16  ;;  %v174_v23 = vsel %vm166_vm3, %v123_v15, %v170_v17 }
  0x9a   :  { %261 = vmatmul.f32.vlgmr.msrb.gmra.mxu0 %v173_v22  ;;  %281 = vmatmul.f32.vlgmr.msrb.gmra.mxu1 %v174_v23 }
  0x9b   :  { %v171_v24 = vmul.f32 0.01, %v143_v20  ;;  %v172_v25 = vmul.f32 0.01, %v163_v21  ;;  %vm167_vm4 = vcmp.gt.f32.partialorder %v143_v20, 0.0  ;;  %vm168_vm5 = vcmp.gt.f32.partialorder %v163_v21, 0.0 }
  0x9d   :  { %v175_v26 = vsel %vm167_vm4, %v143_v20, %v171_v24  ;;  %v176_v27 = vsel %vm168_vm5, %v163_v21, %v172_v25 }
  0x9e   :  { %301 = vmatmul.f32.vlgmr.msrb.gmra.mxu2 %v175_v26  ;;  %321 = vmatmul.f32.vlgmr.msrb.gmra.mxu3 %v176_v27 }
 0x117   :  { %v262_v29 = vpop.f32.mrf.mxu0  ;;  %v282_v31 = vpop.f32.mrf.mxu1 }
 0x118   :  { %v263_v30 = vadd.f32 %v345_v28, %v262_v29 }
 0x11a   :  { %v283_v32 = vadd.f32 %v282_v31, %v263_v30 }
 0x121   :  { %v302_v33 = vpop.f32.mrf.mxu2  ;;  %v322_v35 = vpop.f32.mrf.mxu3 }
 0x122   :  { %v303_v34 = vadd.f32 %v302_v33, %v283_v32 }
 0x124   :  { %v323_v36 = vadd.f32 %v322_v35, %v303_v34 }
 0x126   :  { %326 = vst.msk [vmem:[%s459_s5] sm:$0xff] %vm325_vm6, %v323_v36 }
 0x127   :  { %331 = vsyncpa [#allocation3], 1 }
 0x128   :  { %332 = vsyncpa [#allocation5], 1 }

</bundles_post_ra>
